<compile_context>
chip_gen: v6e
topology: v6e:2x2x1
jax: 0.10.0
libtpu: 0.0.40
codegen_flags: <defaults>
</compile_context>

<pallas_src>
import jax
import jax.numpy as jnp
from jax.experimental import pallas as pl
from jax.experimental.pallas import tpu as pltpu


def _round_up(x, m):
    return ((x + m - 1) // m) * m


def _gcn_agg_kernel(adj_ref, xw_ref, b_ref, out_ref, acc_ref):
    """Grid step (i, k) of  out = ReLU(A @ XW + b).

    adj_ref: (tm, tk)  bf16  -- tile (i, k) of the normalized adjacency
    xw_ref:  (tk, Fp)  bf16  -- k-th row tile of the precomputed X @ W
    b_ref:   (1,  Fp)  f32   -- bias (lane-padded)
    out_ref: (tm, Fp)        -- i-th row tile of the output
    acc_ref: (tm, Fp)  f32   -- VMEM accumulator, resident across the k axis
    """
    k = pl.program_id(1)

    @pl.when(k == 0)
    def _init():
        acc_ref[...] = jnp.zeros_like(acc_ref)

    # MXU: bf16 inputs, f32 accumulation.
    acc_ref[...] += jnp.dot(adj_ref[...], xw_ref[...],
                            preferred_element_type=jnp.float32)

    @pl.when(k == pl.num_programs(1) - 1)
    def _finalize():
        out_ref[...] = jnp.maximum(acc_ref[...] + b_ref[...],
                                   0.0).astype(out_ref.dtype)


def gnn_encoder_forward(adj, x, w, b, *, tm=256, tk=256,
                        out_dtype=jnp.float32):
    """Fused GCN layer: ReLU(adj @ x @ w + b).

    adj: (N, N) float32 normalized adjacency
    x:   (N, F_in) float32 node features
    w:   (F_in, F_out) float32
    b:   (1, F_out) float32
    returns (N, F_out) out_dtype
    """
    n, _ = x.shape
    f_out = w.shape[1]

    # Hoist the feature transform out of the N^2 reduction (tiny matmul;
    # the Pallas kernel then only streams the adjacency once).
    xw = jnp.dot(x, w, preferred_element_type=jnp.float32)

    # Lane-dense output: pad F_out up to a multiple of 128.
    f_pad = _round_up(f_out, 128)

    # Clamp tiles for small graphs while keeping (8, 128) alignment.
    tm = min(tm, _round_up(n, 8))      # sublane dim of adj/out tiles
    tk = min(tk, _round_up(n, 128))    # lane dim of adj tiles / sublane of XW
    n_rows = _round_up(n, tm)
    n_cols = _round_up(n, tk)

    # Zero-pad and down-cast the memory-bound operands to bf16.
    adj_p = jnp.zeros((n_rows, n_cols), jnp.bfloat16)
    adj_p = adj_p.at[:n, :n].set(adj.astype(jnp.bfloat16))
    xw_p = jnp.zeros((n_cols, f_pad), jnp.bfloat16)
    xw_p = xw_p.at[:n, :f_out].set(xw.astype(jnp.bfloat16))
    b_p = jnp.zeros((1, f_pad), jnp.float32)
    b_p = b_p.at[:, :f_out].set(b.astype(jnp.float32))

    grid = (n_rows // tm, n_cols // tk)

    out_p = pl.pallas_call(
        _gcn_agg_kernel,
        out_shape=jax.ShapeDtypeStruct((n_rows, f_pad), out_dtype),
        grid_spec=pltpu.PrefetchScalarGridSpec(
            num_scalar_prefetch=0,
            grid=grid,
            in_specs=[
                pl.BlockSpec((tm, tk), lambda i, k: (i, k)),      # adjacency
                pl.BlockSpec((tk, f_pad), lambda i, k: (k, 0)),   # X @ W
                pl.BlockSpec((1, f_pad), lambda i, k: (0, 0)),    # bias
            ],
            out_specs=pl.BlockSpec((tm, f_pad), lambda i, k: (i, 0)),
            scratch_shapes=[pltpu.VMEM((tm, f_pad), jnp.float32)],
        ),
        compiler_params=pltpu.CompilerParams(
            dimension_semantics=("parallel", "arbitrary")),
    )(adj_p, xw_p, b_p)

    return out_p[:n, :f_out]


def get_output_dim(w):
    return w.shape[1]


def _reference(adj, x, w, b):
    return jnp.maximum(adj @ (x @ w) + b, 0.0)


if __name__ == "__main__":
    key = jax.random.PRNGKey(0)
    k_x, k_w, k_b, k_a = jax.random.split(key, 4)

    # Small but non-trivial: exercises both grid axes (rows and K reduction)
    # and the lane-padding path (F_out=48 -> 128).
    n_nodes, f_in, f_out = 320, 32, 48

    x = jax.random.normal(k_x, (n_nodes, f_in), dtype=jnp.float32)
    w = jax.random.normal(k_w, (f_in, f_out), dtype=jnp.float32) * 0.1
    b = jax.random.normal(k_b, (1, f_out), dtype=jnp.float32) * 0.1

    # Random symmetric adjacency with self loops, symmetric-normalized (GCN).
    a_raw = (jax.random.uniform(k_a, (n_nodes, n_nodes)) > 0.7).astype(jnp.float32)
    a_sym = jnp.maximum(a_raw, a_raw.T) + jnp.eye(n_nodes, dtype=jnp.float32)
    deg = jnp.sum(a_sym, axis=-1)
    d_inv_sqrt = 1.0 / jnp.sqrt(deg)
    adj = a_sym * d_inv_sqrt[:, None] * d_inv_sqrt[None, :]

    out = gnn_encoder_forward(adj, x, w, b)
    out = jax.block_until_ready(out)

    ref = _reference(adj, x, w, b)
    assert out.shape == (n_nodes, f_out)
    # bf16 adjacency / XW path -> relaxed tolerance vs. the f32 reference.
    max_err = float(jnp.max(jnp.abs(out - ref)))
    assert max_err < 3e-2, f"mismatch vs reference, max abs err = {max_err}"

    print("KERNEL_OK")
</pallas_src>

<mosaic_0001>
module attributes {stable_mosaic.version = 11 : i64} {
  func.func @_gcn_agg_kernel(%arg0: i32, %arg1: i32, %arg2: memref<256x256xbf16, #tpu.memory_space<vmem>>, %arg3: memref<256x128xbf16, #tpu.memory_space<vmem>>, %arg4: memref<1x128xf32, #tpu.memory_space<vmem>>, %arg5: memref<256x128xf32, #tpu.memory_space<vmem>>, %arg6: memref<256x128xf32, #tpu.memory_space<vmem>>) attributes {dimension_semantics = [#tpu.dimension_semantics<parallel>, #tpu.dimension_semantics<arbitrary>], iteration_bounds = array<i64: 2, 2>, scalar_prefetch = 0 : i64, scratch_operands = 1 : i64, tpu.core_type = #tpu.core_type<tc>, window_params = [{transform_indices = @transform_0, window_bounds = array<i64: 256, 256>}, {transform_indices = @transform_1, window_bounds = array<i64: 256, 128>}, {pipeline_mode = #tpu.pipeline_mode<synchronous>, transform_indices = @transform_2, window_bounds = array<i64: 1, 128>}, {transform_indices = @transform_3, window_bounds = array<i64: 256, 128>}]} {
    %c0_i32 = arith.constant 0 : i32
    %0 = arith.cmpi eq, %arg1, %c0_i32 : i32
    %1 = arith.extui %0 : i1 to i32
    %c0_i32_0 = arith.constant 0 : i32
    %2 = arith.cmpi ne, %1, %c0_i32_0 : i32
    scf.if %2 {
      %cst_9 = arith.constant 0.000000e+00 : f32
      %12 = vector.broadcast %cst_9 : f32 to vector<256x128xf32>
      %c0_10 = arith.constant 0 : index
      %c0_11 = arith.constant 0 : index
      %13 = vector.load %arg6[%c0_10, %c0_11] : memref<256x128xf32, #tpu.memory_space<vmem>>, vector<256x128xf32>
      tpu.vector_store %arg6[%c0_10, %c0_11], %12 {strides = array<i32>} : memref<256x128xf32, #tpu.memory_space<vmem>>, vector<256x128xf32>,
    } else {
    }
    %c0 = arith.constant 0 : index
    %c0_1 = arith.constant 0 : index
    %3 = vector.load %arg6[%c0, %c0_1] : memref<256x128xf32, #tpu.memory_space<vmem>>, vector<256x128xf32>
    %c0_2 = arith.constant 0 : index
    %c0_3 = arith.constant 0 : index
    %4 = vector.load %arg2[%c0_2, %c0_3] : memref<256x256xbf16, #tpu.memory_space<vmem>>, vector<256x256xbf16>
    %c0_4 = arith.constant 0 : index
    %c0_5 = arith.constant 0 : index
    %5 = vector.load %arg3[%c0_4, %c0_5] : memref<256x128xbf16, #tpu.memory_space<vmem>>, vector<256x128xbf16>
    %cst = arith.constant dense<0.000000e+00> : vector<256x128xf32>
    %6 = tpu.matmul %4, %5, %cst {dimension_numbers = #tpu.dot_dimension_numbers<[1], [0], [0], [1], [0, 0, 1, 1], [], []>} : vector<256x256xbf16>, vector<256x128xbf16>, vector<256x128xf32> -> vector<256x128xf32>
    %7 = arith.addf %3, %6 : vector<256x128xf32>
    %c0_6 = arith.constant 0 : index
    %c0_7 = arith.constant 0 : index
    %8 = vector.load %arg6[%c0_6, %c0_7] : memref<256x128xf32, #tpu.memory_space<vmem>>, vector<256x128xf32>
    tpu.vector_store %arg6[%c0_6, %c0_7], %7 {strides = array<i32>} : memref<256x128xf32, #tpu.memory_space<vmem>>, vector<256x128xf32>,
    %c1_i32 = arith.constant 1 : i32
    %9 = arith.cmpi eq, %arg1, %c1_i32 : i32
    %10 = arith.extui %9 : i1 to i32
    %c0_i32_8 = arith.constant 0 : i32
    %11 = arith.cmpi ne, %10, %c0_i32_8 : i32
    scf.if %11 {
      %c0_9 = arith.constant 0 : index
      %c0_10 = arith.constant 0 : index
      %12 = vector.load %arg6[%c0_9, %c0_10] : memref<256x128xf32, #tpu.memory_space<vmem>>, vector<256x128xf32>
      %c0_11 = arith.constant 0 : index
      %c0_12 = arith.constant 0 : index
      %13 = vector.load %arg4[%c0_11, %c0_12] : memref<1x128xf32, #tpu.memory_space<vmem>>, vector<1x128xf32>
      %14 = vector.broadcast %13 : vector<1x128xf32> to vector<256x128xf32>
      %15 = arith.addf %12, %14 : vector<256x128xf32>
      %cst_13 = arith.constant 0.000000e+00 : f32
      %16 = vector.broadcast %cst_13 : f32 to vector<256x128xf32>
      %17 = arith.maximumf %15, %16 : vector<256x128xf32>
      %c0_14 = arith.constant 0 : index
      %c0_15 = arith.constant 0 : index
      %18 = vector.load %arg5[%c0_14, %c0_15] : memref<256x128xf32, #tpu.memory_space<vmem>>, vector<256x128xf32>
      tpu.vector_store %arg5[%c0_14, %c0_15], %17 {strides = array<i32>} : memref<256x128xf32, #tpu.memory_space<vmem>>, vector<256x128xf32>,
    } else {
    }
    return
  }
  func.func @transform_0(%arg0: i32, %arg1: i32) -> (i32, i32) {
    %c0_i32 = arith.constant 0 : i32
    return %arg0, %arg1 : i32, i32
  }
  func.func @transform_1(%arg0: i32, %arg1: i32) -> (i32, i32) {
    %c0_i32 = arith.constant 0 : i32
    %c0_i32_0 = arith.constant 0 : i32
    return %arg1, %c0_i32 : i32, i32
  }
  func.func @transform_2(%arg0: i32, %arg1: i32) -> (i32, i32) {
    %c0_i32 = arith.constant 0 : i32
    %c0_i32_0 = arith.constant 0 : i32
    %c0_i32_1 = arith.constant 0 : i32
    return %c0_i32, %c0_i32_0 : i32, i32
  }
  func.func @transform_3(%arg0: i32, %arg1: i32) -> (i32, i32) {
    %c0_i32 = arith.constant 0 : i32
    %c0_i32_0 = arith.constant 0 : i32
    return %arg0, %c0_i32 : i32, i32
  }
}

</mosaic_0001>

<bundles_post_ra>
// kernel: tpu_custom_call.1
= control target key start
LH: loop header
LB: loop body
LE: loop exit
PB: predicated region body
PF: predicated region fallthrough
CT: control target
= control target key end

     0   :  { %s2183_s0 = inlined_call_operand.hbm [shape: bf16[512,512], index: 0, kind: input, shape index: {}]   ;;  %s2184_s1 = inlined_call_operand.hbm [shape: bf16[512,128], index: 1, kind: input, shape index: {}]   ;;  %s2185_s2 = inlined_call_operand.vmem [shape: f32[1,128], index: 2, kind: input, shape index: {}]   ;;  %s2186_s3 = inlined_call_operand.hbm [shape: f32[512,128], index: 3, kind: output, shape index: {}]  }
   0x1   :  { %2192 = sst [smem:[#allocation17_spill]] %s2183_s0 }
   0x2   :  { %2193 = sst [smem:[#allocation18_spill]] %s2185_s2 }
   0x3   :  { %2194 = sst [smem:[#allocation19_spill]] %s2186_s3 }
   0x4   :  { %8 = vsyncpa [#allocation4], 0 }
   0x5   :  { %10 = vsyncpa [#allocation4 + $0x1], 0 }
   0x6   :  { %11 = vsyncpa [#allocation7], 0 }
   0x7   :  { %13 = vsyncpa [#allocation7 + $0x1], 0 }
   0x8   :  { %14 = vsyncpa [#allocation5], 0 }
   0x9   :  { %16 = vsyncpa [#allocation5 + $0x1], 0  ;;  %s1770_s12 = smov 0   ;;  %s1772_s13 = smov 0  }
   0xa   :  { %s1774_s14 = smov 0   ;;  %s1776_s15 = smov 0  }
   0xb   :  { %s1778_s16 = smov 0   ;;  %s1780_s17 = smov 0  }
   0xc   :  { %s1782_s18 = smov 0   ;;  %s1784_s19 = smov 0  }
   0xd   :  { %s1786_s20 = smov 0   ;;  %s1788_s21 = smov 0  }
   0xe   :  { %s1790_s22 = smov 0   ;;  %s1792_s23 = smov 0  }
   0xf   :  { %s1794_s24 = smov 0   ;;  %s1796_s25 = smov 0  }
  0x10 LB: > { %2195 = sst [smem:[#allocation12_spill]] %s1721_s21  ;;  %s31_s26 = sadd.s32 1, %s1729_s23  ;;  %s1737_s25 = sphi %s1796_s25, %s22_s25   ;;  %s1733_s24 = sphi %s1794_s24, %s2220_s24   ;;  %s1729_s23 = sphi %s1792_s23, %s2232_s23   ;;  %s1725_s22 = sphi %s1790_s22, %s2231_s22   ;;  %s1721_s21 = sphi %s1788_s21, %s2230_s21   ;;  %s1717_s20 = sphi %s1786_s20, %s2229_s20   ;;  %s1713_s19 = sphi %s1784_s19, %s2228_s19   ;;  %s1709_s18 = sphi %s1782_s18, %s2227_s18   ;;  %s1705_s17 = sphi %s1780_s17, %s2226_s17   ;;  %s1701_s16 = sphi %s1778_s16, %s2225_s16   ;;  %s1697_s15 = sphi %s1776_s15, %s2224_s15   ;;  %s1693_s14 = sphi %s1774_s14, %s2223_s14   ;;  %s1689_s13 = sphi %s1772_s13, %s2222_s13   ;;  %s1685_s12 = sphi %s1770_s12, %s2221_s12  }
  0x11   : > { %2196 = sst [smem:[#allocation13_spill]] %s1725_s22  ;;  %s34_s27 = sadd.s32 1, %s1733_s24 }
  0x12   : > { %2197 = sst [smem:[#allocation14_spill]] %s1733_s24  ;;  %p32_p0 = scmp.ge.s32.totalorder %s31_s26, 2 }
  0x13   : > { %s43_s28 = sadd.s32 1, %s1717_s20  ;;  %p50_p1 = scmp.ne.s32.totalorder %s1717_s20, %s1713_s19 }
  0x14   : > { %p51_p2 = scmp.eq.s32.totalorder %s1737_s25, 0  ;;  %s2234_s26 = smov (%p32_p0, %s31_s26), 0 }
  0x15   : > { %2198 = sst [smem:[#allocation15_spill]] %s2234_s26  ;;  %s2236_s27 = smov (!%p32_p0, %s34_s27), %s1733_s24 }
  0x16   : > { %s1851_s29 = ssub.s32 %s1729_s23, %s2234_s26  ;;  %p1855_p3 = por %p51_p2, %p50_p1 }
  0x17   : > { %p36_p4 = scmp.ge.s32.totalorder %s2236_s27, 2  ;;  %p56_p5 = scmp.ne.s32.totalorder %s1713_s19, %s1709_s18 }
  0x18   : > { %s116_s4 = sadd.s32 1, %s1693_s14  ;;  %p2190_p6 = scmp.lt.s32.totalorder %s1737_s25, 4 }
  0x19   : > { %s2238_s27 = smov (%p36_p4, %s2236_s27), 0  ;;  %s156_s5 = sand.u32 1, %s1717_s20  }
  0x1a   : > { %2200 = sst [smem:[#allocation16_spill]] %s2238_s27  ;;  %s38_s6 = ssub.s32 %s1733_s24, %s2238_s27 }
  0x1b   : > { %s40_s7 = sor.u32 %s1851_s29, %s38_s6  ;;  %p114_p7 = scmp.eq.s32.totalorder %s38_s6, 0 }
  0x1c   : > { %p41_p8 = scmp.eq.s32.totalorder %s40_s7, 0  ;;  %s1131_s8 = sshll.u32 %s156_s5, 8 }
  0x1d   : > { %s1870_s9 = scalar_select %p114_p7, %s1693_s14, %s116_s4  }
  0x1e   : > { %s1873_s10 = scalar_select %p41_p8, %s1717_s20, %s43_s28  }
  0x1f   : > { %s1133_s11 = sshll.u32 %s1729_s23, 1  ;;  %s1199_s26 = sshll.u32 %s1733_s24, 7 }
  0x20   : > { %s160_s3 = scalar_lea.vmem [#allocation3], %s1131_s8  ;;  %s167_s2 = sadd.s32 %s1199_s26, %s1133_s11 }
  0x21   : > { %s170_s22 = sshll.u32 %s160_s3, 4  ;;  %s1135_s21 = sshll.u32 %s167_s2, 6  ;;  %s171_s22 = int_to_ptr.vmem [resolvable:$true] %s170_s22 }
  0x22   : > { %p1881_p9 = pnand %p2190_p6, %p1855_p3  ;;  %s2202_s0 = sld [smem:[#allocation17_spill]] }
  0x23   : > { %p1139_p10 = scmp.ge.s32.totalorder %s1737_s25, 1  ;;  %s157_s28 = scalar_lea.sflag [#allocation4], %s156_s5 }
  0x24   : > { %p1535_p11 = pneg %p1881_p9  ;;  %s1546_s8 = scalar_lea.vmem %s171_s22, 4096 }
  0x25   : > { %p1547_p12 = scmp.ne.s32.totalorder %s171_s22, %s1546_s8  ;;  %s1739_s2 = smov [#allocation3]  }
  0x26   : > { %s1551_s3 = sshll.u32 %s1739_s2, 4  ;;  %s1552_s3 = int_to_ptr.vmem [resolvable:$false] %s1551_s3 }
  0x27   : > { %p1549_p13 = pnand %p1547_p12, %p1535_p11  ;;  %s1553_s26 = scalar_lea.vmem %s1552_s3, 8192 }
  0x28   : > { %s169_s4 = scalar_lea.hbm %s2202_s0, %s1135_s21  ;;  %p1554_p1 = scmp.lt.s32.totalorder %s171_s22, %s1552_s3 }
  0x29   : > { %p1550_p0 = pneg %p1549_p13  ;;  %p1555_p3 = scmp.lt.s32.totalorder %s1553_s26, %s1546_s8 }
  0x2b   : > { %p1556_p4 = por %p1555_p3, %p1554_p1 }
  0x2d   : > { %p1557_p7 = pnand %p1556_p4, %p1550_p0 }
  0x2f   : > { %1560 = shalt.err (!%p1557_p7)
}
  0x30   : > { %s1740_s30 = smov 256   ;;  %s1741_s21 = smov 128  }
  0x31   : > { %s1742_s5 = smov 8   ;;  %p199_p8 = scmp.lt.s32.totalorder %s1737_s25, 5 }
  0x32   : > { %1339 = dma.hbm_to_vmem [thread:$0]  (!%p1881_p9), %s169_s4, 4096, %s171_s22, %s157_s28, %s1740_s30, %s1741_s21, %s1742_s5  }
  0x33   : > { %p1896_p11 = pnand %p1139_p10, %p199_p8  ;;  %s1127_s6 = sadd.s32 4294967295, %s1737_s25  }
  0x34   : > { %s1128_s7 = sadd.s32 4294967294, %s1737_s25   ;;  %p57_p12 = scmp.eq.s32.totalorder %s1127_s6, 0 }
  0x35   : > { %p67_p13 = scmp.eq.s32.totalorder %s1851_s29, 0  ;;  %s69_s8 = sadd.s32 1, %s1705_s17 }
  0x36   : > { %p76_p0 = scmp.ne.s32.totalorder %s1705_s17, %s1701_s16  ;;  %p1909_p1 = por %p57_p12, %p56_p5 }
  0x37   : > { %p82_p9 = scmp.ne.s32.totalorder %s1701_s16, %s1697_s15  ;;  %p126_p4 = scmp.ne.s32.totalorder %s1693_s14, %s1689_s13 }
  0x38   : > { %s1916_s22 = scalar_select %p67_p13, %s1705_s17, %s69_s8  }
  0x39   : > { %p1920_p10 = por %p76_p0, %p51_p2  ;;  %p1924_p3 = por %p82_p9, %p57_p12 }
  0x3a   : > { %p127_p7 = scmp.eq.s32.totalorder %s1127_s6, 3  ;;  %p132_p5 = scmp.ne.s32.totalorder %s1689_s13, %s1685_s12 }
  0x3b   : > { %p133_p8 = scmp.eq.s32.totalorder %s1128_s7, 3  ;;  %s180_s15 = sand.u32 1, %s1705_s17  }
  0x3c   : > { %p1932_p6 = por %p127_p7, %p126_p4  ;;  %s1136_s2 = sshll.u32 %s180_s15, 7 }
  0x3d   : > { %p1937_p13 = por %p133_p8, %p132_p5  ;;  %s1200_s3 = sshll.u32 %s1729_s23, 11 }
  0x3e   : > { %s190_s21 = scalar_lea.hbm %s2184_s1, %s1200_s3  ;;  %s184_s5 = scalar_lea.vmem [#allocation6], %s1136_s2 }
  0x3f   : > { %s2208_s28 = scalar_select %p1937_p13, 1, 0 }
  0x40   : > { %s191_s8 = sshll.u32 %s184_s5, 4  ;;  %p2209_p2 = scmp.lt.s32.totalorder %s1737_s25, 4  ;;  %s192_s8 = int_to_ptr.vmem [resolvable:$true] %s191_s8 }
  0x41   : > { %s181_s7 = scalar_lea.sflag [#allocation7], %s180_s15  ;;  %s1574_s0 = scalar_lea.vmem %s192_s8, 2048 }
  0x42   : > { %p1949_p12 = pnand %p2209_p2, %p1920_p10  ;;  %p1575_p9 = scmp.ne.s32.totalorder %s192_s8, %s1574_s0 }
  0x43   : > { %s1743_s24 = smov [#allocation6]  }
  0x44   : > { %p1563_p0 = pneg %p1949_p12  ;;  %s1579_s26 = sshll.u32 %s1743_s24, 4  ;;  %s1580_s26 = int_to_ptr.vmem [resolvable:$false] %s1579_s26 }
  0x45   : > { %s1581_s2 = scalar_lea.vmem %s1580_s26, 4096  ;;  %p1582_p5 = scmp.lt.s32.totalorder %s192_s8, %s1580_s26 }
  0x46   : > { %p1577_p4 = pnand %p1575_p9, %p1563_p0  ;;  %p1583_p8 = scmp.lt.s32.totalorder %s1581_s2, %s1574_s0 }
  0x48   : > { %p1578_p7 = pneg %p1577_p4  ;;  %p1584_p13 = por %p1583_p8, %p1582_p5 }
  0x4a   : > { %p1585_p10 = pnand %p1584_p13, %p1578_p7 }
  0x4c   : > { %1588 = shalt.err (!%p1585_p10)
}
  0x4d   : > { %s1744_s4 = smov 64   ;;  %s1745_s3 = smov 4  }
  0x4e   : > { %1342 = dma.hbm_to_vmem [thread:$0]  (!%p1949_p12), %s190_s21, 2048, %s192_s8, %s181_s7, %s1744_s4, %s1744_s4, %s1745_s3  }
  0x4f   : > { %203 = sbr.rel (%p1896_p11) target bundleno = 458 (0x1ca), region = 32  ;;  %s205_s15 = sand.u32 (!%p1896_p11), 1, %s1713_s19  }
  0x50   : > { %s1140_s30 = sshll.u32 (!%p1896_p11), %s205_s15, 8  ;;  %s206_s24 = scalar_lea.sflag (!%p1896_p11), [#allocation4], %s205_s15 }
  0x51   : > { %s1960_s5 = scalar_lea.vmem (!%p1896_p11), [#allocation3], %s1140_s30 }
  0x54   : > { %1672 = dma.done.wait (%p1909_p1), %s206_s24, 4096  }
  0x55   : > { %1674 = vsyncadd (%p1909_p1), %s206_s24, 4294963200  ;;  %s214_s0 = sand.u32 1, %s1701_s16  }
  0x56   : > { %s1141_s6 = sshll.u32 %s214_s0, 7  ;;  %s215_s21 = scalar_lea.sflag [#allocation7], %s214_s0 }
  0x57   : > { %s1967_s8 = scalar_lea.vmem [#allocation6], %s1141_s6 }
  0x58   : > { %1676 = dma.done.wait (%p1924_p3), %s215_s21, 2048  }
  0x59   : > { %1678 = vsyncadd (%p1924_p3), %s215_s21, 4294965248  ;;  %s243_s11 = sand.u32 1, %s1689_s13   ;;  %s2211_s27 = sld [smem:[#allocation12_spill]] }
  0x5a   : > { %s1142_s7 = sshll.u32 %s243_s11, 8 }
  0x5b   : > { %s1976_s26 = scalar_lea.vmem [#allocation8], %s1142_s7 }
  0x5f   : > { %p1143_p11 = scmp.ne.s32.totalorder %s2211_s27, 0 }
  0x61   : > { %254 = sbr.rel (%p1143_p11) target bundleno = 119 (0x77), region = 44 }
  0x66   : > { %v1746_v0 = vmov 0.0  }
  0x67   : > { %255 = vst [vmem:[#allocation2 + $0xb0] sm:$0xff] %v1746_v0  ;;  %256 = vst [vmem:[#allocation2] sm:$0xff] %v1746_v0 }
  0x68   : > { %257 = vst [vmem:[#allocation2 + $0xd8] sm:$0xff] %v1746_v0  ;;  %258 = vst [vmem:[#allocation2 + $0x18] sm:$0xff] %v1746_v0 }
  0x69   : > { %259 = vst [vmem:[#allocation2 + $0x50] sm:$0xff] %v1746_v0  ;;  %260 = vst [vmem:[#allocation2 + $0x68] sm:$0xff] %v1746_v0 }
  0x6a   : > { %261 = vst [vmem:[#allocation2 + $0x30] sm:$0xff] %v1746_v0  ;;  %262 = vst [vmem:[#allocation2 + $0x48] sm:$0xff] %v1746_v0 }
  0x6b   : > { %263 = vst [vmem:[#allocation2 + $0x80] sm:$0xff] %v1746_v0  ;;  %264 = vst [vmem:[#allocation2 + $0x88] sm:$0xff] %v1746_v0 }
  0x6c   : > { %265 = vst [vmem:[#allocation2 + $0xe8] sm:$0xff] %v1746_v0  ;;  %266 = vst [vmem:[#allocation2 + $0xb8] sm:$0xff] %v1746_v0 }
  0x6d   : > { %267 = vst [vmem:[#allocation2 + $0x60] sm:$0xff] %v1746_v0  ;;  %268 = vst [vmem:[#allocation2 + $0xf0] sm:$0xff] %v1746_v0 }
  0x6e   : > { %269 = vst [vmem:[#allocation2 + $0x8] sm:$0xff] %v1746_v0  ;;  %270 = vst [vmem:[#allocation2 + $0x78] sm:$0xff] %v1746_v0 }
  0x6f   : > { %271 = vst [vmem:[#allocation2 + $0x38] sm:$0xff] %v1746_v0  ;;  %272 = vst [vmem:[#allocation2 + $0x58] sm:$0xff] %v1746_v0 }
  0x70   : > { %273 = vst [vmem:[#allocation2 + $0x40] sm:$0xff] %v1746_v0  ;;  %274 = vst [vmem:[#allocation2 + $0xc8] sm:$0xff] %v1746_v0 }
  0x71   : > { %275 = vst [vmem:[#allocation2 + $0xe0] sm:$0xff] %v1746_v0  ;;  %276 = vst [vmem:[#allocation2 + $0x90] sm:$0xff] %v1746_v0 }
  0x72   : > { %277 = vst [vmem:[#allocation2 + $0x70] sm:$0xff] %v1746_v0  ;;  %278 = vst [vmem:[#allocation2 + $0xc0] sm:$0xff] %v1746_v0 }
  0x73   : > { %279 = vst [vmem:[#allocation2 + $0xa8] sm:$0xff] %v1746_v0  ;;  %280 = vst [vmem:[#allocation2 + $0xd0] sm:$0xff] %v1746_v0 }
  0x74   : > { %281 = vst [vmem:[#allocation2 + $0x10] sm:$0xff] %v1746_v0  ;;  %282 = vst [vmem:[#allocation2 + $0x28] sm:$0xff] %v1746_v0 }
  0x75   : > { %283 = vst [vmem:[#allocation2 + $0xa0] sm:$0xff] %v1746_v0  ;;  %284 = vst [vmem:[#allocation2 + $0xf8] sm:$0xff] %v1746_v0 }
  0x76   : > { %285 = vst [vmem:[#allocation2 + $0x20] sm:$0xff] %v1746_v0  ;;  %286 = vst [vmem:[#allocation2 + $0x98] sm:$0xff] %v1746_v0 }
  0x77 PF: > { %v1469_v1 = vld [vmem:[%s1967_s8 + $0x78] sm:$0xff]   ;;  %v1471_v3 = vld [vmem:[%s1967_s8 + $0x70] sm:$0xff]   ;;  %v1473_v5 = vld [vmem:[%s1967_s8 + $0x68] sm:$0xff]   ;;  %s2212_s29 = sld [smem:[#allocation12_spill]] }
  0x78   : > { %v1470_v2 = vld [vmem:[%s1967_s8 + $0x38] sm:$0xff]   ;;  %1202 = vmatprep.subr.bf16.mxu0 %v1469_v1  ;;  %1314 = vmatprep.subr.bf16.mxu1 %v1469_v1  ;;  %v1472_v4 = vld [vmem:[%s1967_s8 + $0x30] sm:$0xff]   ;;  %v1474_v6 = vld [vmem:[%s1967_s8 + $0x28] sm:$0xff]  }
  0x79   : > { %1203 = vmatpush3.bf16.msra.mxu0 %v1470_v2  ;;  %1322 = vmatpush3.bf16.msra.mxu1 %v1470_v2  ;;  %v1475_v7 = vld [vmem:[%s1967_s8 + $0x60] sm:$0xff]   ;;  %v1477_v9 = vld [vmem:[%s1967_s8 + $0x58] sm:$0xff]   ;;  %v1479_v11 = vld [vmem:[%s1967_s8 + $0x50] sm:$0xff]  }
  0x7a   : > { %1204 = vmatprep.subr.bf16.mxu0 %v1471_v3  ;;  %1315 = vmatprep.subr.bf16.mxu1 %v1471_v3  ;;  %v1476_v8 = vld [vmem:[%s1967_s8 + $0x20] sm:$0xff]   ;;  %v1478_v10 = vld [vmem:[%s1967_s8 + $0x18] sm:$0xff]   ;;  %v1480_v14 = vld [vmem:[%s1967_s8 + $0x10] sm:$0xff]  }
  0x7b   : > { %v1487_v12 = vld [vmem:[%s1960_s5 + $0x4] ss:$8 sps:$4 sm:$0xff]   ;;  %v1485_v19 = vld [vmem:[%s1960_s5] ss:$8 sps:$4 sm:$0xff]   ;;  %v1491_v21 = vld [vmem:[%s1960_s5 + $0x14] ss:$8 sps:$4 sm:$0xff]  }
  0x7c   : > { %v1490_v13 = vld [vmem:[%s1960_s5 + $0x84] ss:$8 sps:$4 sm:$0xff]   ;;  %671 = vmatprep.mubr.bf16.mxu0 %v1487_v12  ;;  %v1488_v20 = vld [vmem:[%s1960_s5 + $0x80] ss:$8 sps:$4 sm:$0xff]   ;;  %v1493_v22 = vld [vmem:[%s1960_s5 + $0x94] ss:$8 sps:$4 sm:$0xff]  }
  0x7d   : > { %1205 = vmatpush3.bf16.msra.mxu0 %v1472_v4  ;;  %1323 = vmatpush3.bf16.msra.mxu1 %v1472_v4  ;;  %v1481_v15 = vld [vmem:[%s1967_s8 + $0x48] sm:$0xff]   ;;  %v1483_v17 = vld [vmem:[%s1967_s8 + $0x40] sm:$0xff]   ;;  %v1495_v23 = vld [vmem:[%s1960_s5 + $0x10] ss:$8 sps:$4 sm:$0xff]   ;;  %p1192_p1 = scmp.ne.s32.totalorder %s2212_s29, 1 }
  0x7e   : > { %1206 = vmatprep.subr.bf16.mxu0 %v1473_v5  ;;  %1316 = vmatprep.subr.bf16.mxu1 %v1473_v5  ;;  %v1482_v16 = vld [vmem:[%s1967_s8 + $0x8] sm:$0xff]   ;;  %v1484_v18 = vld [vmem:[%s1967_s8] sm:$0xff]   ;;  %v1496_v24 = vld [vmem:[%s1960_s5 + $0x90] ss:$8 sps:$4 sm:$0xff]   ;;  %s2213_s3 = sld [smem:[#allocation18_spill]] (!%p1192_p1) }
  0x7f   : > { %735 = vmatprep.mubr.bf16.mxu1 %v1490_v13  ;;  %v1497_v25 = vld [vmem:[%s1960_s5 + $0x24] ss:$8 sps:$4 sm:$0xff]   ;;  %v1501_v27 = vld [vmem:[%s1960_s5 + $0x20] ss:$8 sps:$4 sm:$0xff]   ;;  %v1503_v29 = vld [vmem:[%s1960_s5 + $0x34] ss:$8 sps:$4 sm:$0xff]  }
  0x80   : > { %v1499_v26 = vld [vmem:[%s1960_s5 + $0xa4] ss:$8 sps:$4 sm:$0xff]   ;;  %v1502_v28 = vld [vmem:[%s1960_s5 + $0xa0] ss:$8 sps:$4 sm:$0xff]   ;;  %v1505_v30 = vld [vmem:[%s1960_s5 + $0xb4] ss:$8 sps:$4 sm:$0xff]  }
  0x81   : > { %1207 = vmatpush3.bf16.msra.mxu0 %v1474_v6  ;;  %1324 = vmatpush3.bf16.msra.mxu1 %v1474_v6  ;;  %v1507_v31 = vld [vmem:[%s1960_s5 + $0x30] ss:$8 sps:$4 sm:$0xff]   ;;  %v1509_v33 = vld [vmem:[%s1960_s5 + $0x44] ss:$8 sps:$4 sm:$0xff]   ;;  %v1513_v35 = vld [vmem:[%s1960_s5 + $0x40] ss:$8 sps:$4 sm:$0xff]  }
  0x82   : > { %1208 = vmatprep.subr.bf16.mxu0 %v1475_v7  ;;  %1317 = vmatprep.subr.bf16.mxu1 %v1475_v7  ;;  %v1508_v32 = vld [vmem:[%s1960_s5 + $0xb0] ss:$8 sps:$4 sm:$0xff]   ;;  %v1511_v34 = vld [vmem:[%s1960_s5 + $0xc4] ss:$8 sps:$4 sm:$0xff]   ;;  %v1514_v36 = vld [vmem:[%s1960_s5 + $0xc0] ss:$8 sps:$4 sm:$0xff]  }
  0x83   : > { %v1515_v37 = vld [vmem:[%s1960_s5 + $0x54] ss:$8 sps:$4 sm:$0xff]   ;;  %v1519_v39 = vld [vmem:[%s1960_s5 + $0x50] ss:$8 sps:$4 sm:$0xff]   ;;  %v1521_v41 = vld [vmem:[%s1960_s5 + $0x64] ss:$8 sps:$4 sm:$0xff]  }
  0x84   : > { %v1517_v38 = vld [vmem:[%s1960_s5 + $0xd4] ss:$8 sps:$4 sm:$0xff]   ;;  %v1520_v40 = vld [vmem:[%s1960_s5 + $0xd0] ss:$8 sps:$4 sm:$0xff]   ;;  %v1523_v42 = vld [vmem:[%s1960_s5 + $0xe4] ss:$8 sps:$4 sm:$0xff]  }
  0x85   : > { %1209 = vmatpush3.bf16.msra.mxu0 %v1476_v8  ;;  %1325 = vmatpush3.bf16.msra.mxu1 %v1476_v8  ;;  %v1525_v43 = vld [vmem:[%s1960_s5 + $0x60] ss:$8 sps:$4 sm:$0xff]   ;;  %v1527_v45 = vld [vmem:[%s1960_s5 + $0x74] ss:$8 sps:$4 sm:$0xff]   ;;  %v1531_v47 = vld [vmem:[%s1960_s5 + $0x70] ss:$8 sps:$4 sm:$0xff]  }
  0x86   : > { %1210 = vmatprep.subr.bf16.mxu0 %v1477_v9  ;;  %1318 = vmatprep.subr.bf16.mxu1 %v1477_v9  ;;  %v1526_v44 = vld [vmem:[%s1960_s5 + $0xe0] ss:$8 sps:$4 sm:$0xff]   ;;  %v1529_v46 = vld [vmem:[%s1960_s5 + $0xf4] ss:$8 sps:$4 sm:$0xff]   ;;  %v1532_v48 = vld [vmem:[%s1960_s5 + $0xf0] ss:$8 sps:$4 sm:$0xff]  }
  0x87   : > { %v287_v51 = vld [vmem:[#allocation2 + $0xb0] sm:$0xff]  ;;  %v303_v53 = vld [vmem:[#allocation2 + $0x38] sm:$0xff]  ;;  %v288_v61 = vld [vmem:[#allocation2] sm:$0xff] }
  0x88   : > { %v304_v63 = vld [vmem:[#allocation2 + $0x58] sm:$0xff]  ;;  %v305_v9 = vld [vmem:[#allocation2 + $0x40] sm:$0xff] }
  0x89   : > { %1211 = vmatpush3.bf16.msra.mxu0 %v1478_v10  ;;  %1326 = vmatpush3.bf16.msra.mxu1 %v1478_v10  ;;  %v289_v7 = vld [vmem:[#allocation2 + $0xd8] sm:$0xff] }
  0x8a   : > { %1212 = vmatprep.subr.bf16.mxu0 %v1479_v11  ;;  %1319 = vmatprep.subr.bf16.mxu1 %v1479_v11 }
  0x8d   : > { %1213 = vmatpush3.bf16.msra.mxu0 %v1480_v14  ;;  %1327 = vmatpush3.bf16.msra.mxu1 %v1480_v14 }
  0x8e   : > { %1214 = vmatprep.subr.bf16.mxu0 %v1481_v15  ;;  %1320 = vmatprep.subr.bf16.mxu1 %v1481_v15 }
  0x91   : > { %1215 = vmatpush3.bf16.msra.mxu0 %v1482_v16  ;;  %1328 = vmatpush3.bf16.msra.mxu1 %v1482_v16 }
  0x92   : > { %1216 = vmatprep.subr.bf16.mxu0 %v1483_v17  ;;  %1321 = vmatprep.subr.bf16.mxu1 %v1483_v17  ;;  %v290_v17 = vld [vmem:[#allocation2 + $0x18] sm:$0xff] }
  0x95   : > { %1217 = vmatpush3.bf16.msra.mxu0 %v1484_v18  ;;  %1329 = vmatpush3.bf16.msra.mxu1 %v1484_v18 }
  0x98   : > { %672 = vmatmul.mubr.bf16.vlgmr.msra.gmra.mxu0 %v1485_v19  ;;  %736 = vmatmul.mubr.bf16.vlgmr.msra.gmra.mxu1 %v1488_v20  ;;  %v306_v19 = vld [vmem:[#allocation2 + $0xc8] sm:$0xff] }
  0x99   : > { %679 = vmatprep.mubr.bf16.mxu0 %v1491_v21  ;;  %743 = vmatprep.mubr.bf16.mxu1 %v1493_v22 }
  0xa0   : > { %680 = vmatmul.mubr.bf16.gmra.mxu0 %v1495_v23  ;;  %744 = vmatmul.mubr.bf16.gmra.mxu1 %v1496_v24 }
  0xa1   : > { %687 = vmatprep.mubr.bf16.mxu0 %v1497_v25  ;;  %751 = vmatprep.mubr.bf16.mxu1 %v1499_v26 }
  0xa8   : > { %688 = vmatmul.mubr.bf16.gmra.mxu0 %v1501_v27  ;;  %752 = vmatmul.mubr.bf16.gmra.mxu1 %v1502_v28  ;;  %v291_v27 = vld [vmem:[#allocation2 + $0x50] sm:$0xff] }
  0xa9   : > { %695 = vmatprep.mubr.bf16.mxu0 %v1503_v29  ;;  %759 = vmatprep.mubr.bf16.mxu1 %v1505_v30  ;;  %v307_v29 = vld [vmem:[#allocation2 + $0xe0] sm:$0xff] }
  0xb0   : > { %696 = vmatmul.mubr.bf16.gmra.mxu0 %v1507_v31  ;;  %760 = vmatmul.mubr.bf16.gmra.mxu1 %v1508_v32 }
  0xb1   : > { %703 = vmatprep.mubr.bf16.mxu0 %v1509_v33  ;;  %767 = vmatprep.mubr.bf16.mxu1 %v1511_v34 }
  0xb8   : > { %704 = vmatmul.mubr.bf16.gmra.mxu0 %v1513_v35  ;;  %768 = vmatmul.mubr.bf16.gmra.mxu1 %v1514_v36 }
  0xb9   : > { %711 = vmatprep.mubr.bf16.mxu0 %v1515_v37  ;;  %775 = vmatprep.mubr.bf16.mxu1 %v1517_v38  ;;  %v292_v37 = vld [vmem:[#allocation2 + $0x68] sm:$0xff] }
  0xc0   : > { %712 = vmatmul.mubr.bf16.gmra.mxu0 %v1519_v39  ;;  %776 = vmatmul.mubr.bf16.gmra.mxu1 %v1520_v40  ;;  %v308_v39 = vld [vmem:[#allocation2 + $0x90] sm:$0xff] }
  0xc1   : > { %719 = vmatprep.mubr.bf16.mxu0 %v1521_v41  ;;  %783 = vmatprep.mubr.bf16.mxu1 %v1523_v42 }
  0xc8   : > { %720 = vmatmul.mubr.bf16.gmra.mxu0 %v1525_v43  ;;  %784 = vmatmul.mubr.bf16.gmra.mxu1 %v1526_v44 }
  0xc9   : > { %727 = vmatprep.mubr.bf16.mxu0 %v1527_v45  ;;  %791 = vmatprep.mubr.bf16.mxu1 %v1529_v46 }
  0xd0   : > { %728 = vmatmul.mubr.bf16.gmra.mxu0 %v1531_v47  ;;  %792 = vmatmul.mubr.bf16.gmra.mxu1 %v1532_v48  ;;  %v293_v47 = vld [vmem:[#allocation2 + $0x30] sm:$0xff] }
 0x158   : > { %v1218_v49 = vpop.f32.mrf.mxu0  ;;  %v1266_v50 = vpop.f32.mrf.mxu1 }
 0x15a   : > { %v1219_v52 = vpop.f32.mrf.mxu0  ;;  %v1267_v54 = vpop.f32.mrf.mxu1 }
 0x15b   : > { %v1220_v55 = vadd.f32 %v1219_v52, %v1218_v49  ;;  %v1268_v56 = vadd.f32 %v1267_v54, %v1266_v50  ;;  %v309_v49 = vld [vmem:[#allocation2 + $0x70] sm:$0xff] }
 0x15c   : > { %v1221_v57 = vpop.f32.mrf.mxu0  ;;  %v1269_v58 = vpop.f32.mrf.mxu1 }
 0x15d   : > { %v800_v59 = vadd.f32 %v1220_v55, %v287_v51  ;;  %v816_v60 = vadd.f32 %v1268_v56, %v303_v53 }
 0x15e   : > { %v1222_v62 = vpop.f32.mrf.mxu0  ;;  %v1270_v0 = vpop.f32.mrf.mxu1 }
 0x15f   : > { %832 = vst [vmem:[#allocation2 + $0xb0] sm:$0xff] %v800_v59  ;;  %848 = vst [vmem:[#allocation2 + $0x38] sm:$0xff] %v816_v60  ;;  %v1223_v1 = vadd.f32 %v1222_v62, %v1221_v57  ;;  %v1271_v2 = vadd.f32 %v1270_v0, %v1269_v58  ;;  %v294_v57 = vld [vmem:[#allocation2 + $0x48] sm:$0xff]  ;;  %v310_v59 = vld [vmem:[#allocation2 + $0xc0] sm:$0xff] }
 0x160   : > { %v1224_v3 = vpop.f32.mrf.mxu0  ;;  %v1272_v4 = vpop.f32.mrf.mxu1 }
 0x161   : > { %v801_v5 = vadd.f32 %v1223_v1, %v288_v61  ;;  %v817_v6 = vadd.f32 %v1271_v2, %v304_v63 }
 0x162   : > { %v1225_v8 = vpop.f32.mrf.mxu0  ;;  %v1273_v10 = vpop.f32.mrf.mxu1 }
 0x163   : > { %833 = vst [vmem:[#allocation2] sm:$0xff] %v801_v5  ;;  %849 = vst [vmem:[#allocation2 + $0x58] sm:$0xff] %v817_v6  ;;  %v1226_v11 = vadd.f32 %v1225_v8, %v1224_v3  ;;  %v1274_v12 = vadd.f32 %v1273_v10, %v1272_v4  ;;  %v295_v3 = vld [vmem:[#allocation2 + $0x80] sm:$0xff]  ;;  %v311_v5 = vld [vmem:[#allocation2 + $0xa8] sm:$0xff] }
 0x164   : > { %v1227_v13 = vpop.f32.mrf.mxu0  ;;  %v1275_v14 = vpop.f32.mrf.mxu1 }
 0x165   : > { %v802_v15 = vadd.f32 %v1226_v11, %v289_v7  ;;  %v818_v16 = vadd.f32 %v1274_v12, %v305_v9 }
 0x166   : > { %v1228_v18 = vpop.f32.mrf.mxu0  ;;  %v1276_v20 = vpop.f32.mrf.mxu1 }
 0x167   : > { %834 = vst [vmem:[#allocation2 + $0xd8] sm:$0xff] %v802_v15  ;;  %850 = vst [vmem:[#allocation2 + $0x40] sm:$0xff] %v818_v16  ;;  %v1229_v21 = vadd.f32 %v1228_v18, %v1227_v13  ;;  %v1277_v22 = vadd.f32 %v1276_v20, %v1275_v14  ;;  %v296_v13 = vld [vmem:[#allocation2 + $0x88] sm:$0xff]  ;;  %v312_v15 = vld [vmem:[#allocation2 + $0xd0] sm:$0xff] }
 0x168   : > { %v1230_v23 = vpop.f32.mrf.mxu0  ;;  %v1278_v24 = vpop.f32.mrf.mxu1 }
 0x169   : > { %v803_v25 = vadd.f32 %v1229_v21, %v290_v17  ;;  %v819_v26 = vadd.f32 %v1277_v22, %v306_v19 }
 0x16a   : > { %v1231_v28 = vpop.f32.mrf.mxu0  ;;  %v1279_v30 = vpop.f32.mrf.mxu1 }
 0x16b   : > { %835 = vst [vmem:[#allocation2 + $0x18] sm:$0xff] %v803_v25  ;;  %851 = vst [vmem:[#allocation2 + $0xc8] sm:$0xff] %v819_v26  ;;  %v1232_v31 = vadd.f32 %v1231_v28, %v1230_v23  ;;  %v1280_v32 = vadd.f32 %v1279_v30, %v1278_v24  ;;  %v297_v23 = vld [vmem:[#allocation2 + $0xe8] sm:$0xff]  ;;  %v313_v25 = vld [vmem:[#allocation2 + $0x10] sm:$0xff] }
 0x16c   : > { %v1233_v33 = vpop.f32.mrf.mxu0  ;;  %v1281_v34 = vpop.f32.mrf.mxu1 }
 0x16d   : > { %v804_v35 = vadd.f32 %v1232_v31, %v291_v27  ;;  %v820_v36 = vadd.f32 %v1280_v32, %v307_v29 }
 0x16e   : > { %v1234_v38 = vpop.f32.mrf.mxu0  ;;  %v1282_v40 = vpop.f32.mrf.mxu1 }
 0x16f   : > { %836 = vst [vmem:[#allocation2 + $0x50] sm:$0xff] %v804_v35  ;;  %852 = vst [vmem:[#allocation2 + $0xe0] sm:$0xff] %v820_v36  ;;  %v1235_v41 = vadd.f32 %v1234_v38, %v1233_v33  ;;  %v1283_v42 = vadd.f32 %v1282_v40, %v1281_v34  ;;  %v298_v33 = vld [vmem:[#allocation2 + $0xb8] sm:$0xff]  ;;  %v314_v35 = vld [vmem:[#allocation2 + $0x28] sm:$0xff] }
 0x170   : > { %v1236_v43 = vpop.f32.mrf.mxu0  ;;  %v1284_v44 = vpop.f32.mrf.mxu1 }
 0x171   : > { %v805_v45 = vadd.f32 %v1235_v41, %v292_v37  ;;  %v821_v46 = vadd.f32 %v1283_v42, %v308_v39 }
 0x172   : > { %v1237_v48 = vpop.f32.mrf.mxu0  ;;  %v1285_v50 = vpop.f32.mrf.mxu1 }
 0x173   : > { %837 = vst [vmem:[#allocation2 + $0x68] sm:$0xff] %v805_v45  ;;  %853 = vst [vmem:[#allocation2 + $0x90] sm:$0xff] %v821_v46  ;;  %v1238_v51 = vadd.f32 %v1237_v48, %v1236_v43  ;;  %v1286_v52 = vadd.f32 %v1285_v50, %v1284_v44  ;;  %v299_v43 = vld [vmem:[#allocation2 + $0x60] sm:$0xff] }
 0x174   : > { %v1239_v53 = vpop.f32.mrf.mxu0  ;;  %v1287_v54 = vpop.f32.mrf.mxu1  ;;  %v315_v45 = vld [vmem:[#allocation2 + $0xa0] sm:$0xff] }
 0x175   : > { %v806_v55 = vadd.f32 %v1238_v51, %v293_v47  ;;  %v822_v56 = vadd.f32 %v1286_v52, %v309_v49 }
 0x176   : > { %v1240_v58 = vpop.f32.mrf.mxu0  ;;  %v1288_v60 = vpop.f32.mrf.mxu1 }
 0x177   : > { %838 = vst [vmem:[#allocation2 + $0x30] sm:$0xff] %v806_v55  ;;  %854 = vst [vmem:[#allocation2 + $0x70] sm:$0xff] %v822_v56  ;;  %v1241_v61 = vadd.f32 %v1240_v58, %v1239_v53  ;;  %v1289_v62 = vadd.f32 %v1288_v60, %v1287_v54  ;;  %v300_v53 = vld [vmem:[#allocation2 + $0xf0] sm:$0xff]  ;;  %v316_v55 = vld [vmem:[#allocation2 + $0xf8] sm:$0xff] }
 0x178   : > { %v1242_v63 = vpop.f32.mrf.mxu0  ;;  %v1290_v0 = vpop.f32.mrf.mxu1 }
 0x179   : > { %v807_v1 = vadd.f32 %v1241_v61, %v294_v57  ;;  %v823_v2 = vadd.f32 %v1289_v62, %v310_v59 }
 0x17a   : > { %v1243_v4 = vpop.f32.mrf.mxu0  ;;  %v1291_v6 = vpop.f32.mrf.mxu1 }
 0x17b   : > { %839 = vst [vmem:[#allocation2 + $0x48] sm:$0xff] %v807_v1  ;;  %855 = vst [vmem:[#allocation2 + $0xc0] sm:$0xff] %v823_v2  ;;  %v1244_v7 = vadd.f32 %v1243_v4, %v1242_v63  ;;  %v1292_v8 = vadd.f32 %v1291_v6, %v1290_v0  ;;  %v301_v63 = vld [vmem:[#allocation2 + $0x8] sm:$0xff]  ;;  %v317_v1 = vld [vmem:[#allocation2 + $0x20] sm:$0xff] }
 0x17c   : > { %v1245_v9 = vpop.f32.mrf.mxu0  ;;  %v1293_v10 = vpop.f32.mrf.mxu1 }
 0x17d   : > { %v808_v11 = vadd.f32 %v1244_v7, %v295_v3  ;;  %v824_v12 = vadd.f32 %v1292_v8, %v311_v5 }
 0x17e   : > { %v1246_v14 = vpop.f32.mrf.mxu0  ;;  %v1294_v16 = vpop.f32.mrf.mxu1 }
 0x17f   : > { %840 = vst [vmem:[#allocation2 + $0x80] sm:$0xff] %v808_v11  ;;  %856 = vst [vmem:[#allocation2 + $0xa8] sm:$0xff] %v824_v12  ;;  %v1247_v17 = vadd.f32 %v1246_v14, %v1245_v9  ;;  %v1295_v18 = vadd.f32 %v1294_v16, %v1293_v10  ;;  %v302_v9 = vld [vmem:[#allocation2 + $0x78] sm:$0xff] }
 0x180   : > { %v1248_v19 = vpop.f32.mrf.mxu0  ;;  %v1296_v20 = vpop.f32.mrf.mxu1  ;;  %v318_v11 = vld [vmem:[#allocation2 + $0x98] sm:$0xff] }
 0x181   : > { %v809_v21 = vadd.f32 %v1247_v17, %v296_v13  ;;  %v825_v22 = vadd.f32 %v1295_v18, %v312_v15 }
 0x182   : > { %v1249_v24 = vpop.f32.mrf.mxu0  ;;  %v1297_v26 = vpop.f32.mrf.mxu1 }
 0x183   : > { %841 = vst [vmem:[#allocation2 + $0x88] sm:$0xff] %v809_v21  ;;  %857 = vst [vmem:[#allocation2 + $0xd0] sm:$0xff] %v825_v22  ;;  %v1250_v27 = vadd.f32 %v1249_v24, %v1248_v19  ;;  %v1298_v28 = vadd.f32 %v1297_v26, %v1296_v20 }
 0x184   : > { %v1251_v29 = vpop.f32.mrf.mxu0  ;;  %v1299_v30 = vpop.f32.mrf.mxu1 }
 0x185   : > { %v810_v31 = vadd.f32 %v1250_v27, %v297_v23  ;;  %v826_v32 = vadd.f32 %v1298_v28, %v313_v25 }
 0x186   : > { %v1252_v34 = vpop.f32.mrf.mxu0  ;;  %v1300_v36 = vpop.f32.mrf.mxu1 }
 0x187   : > { %842 = vst [vmem:[#allocation2 + $0xe8] sm:$0xff] %v810_v31  ;;  %858 = vst [vmem:[#allocation2 + $0x10] sm:$0xff] %v826_v32  ;;  %v1253_v37 = vadd.f32 %v1252_v34, %v1251_v29  ;;  %v1301_v38 = vadd.f32 %v1300_v36, %v1299_v30 }
 0x188   : > { %v1254_v39 = vpop.f32.mrf.mxu0  ;;  %v1302_v40 = vpop.f32.mrf.mxu1 }
 0x189   : > { %v811_v41 = vadd.f32 %v1253_v37, %v298_v33  ;;  %v827_v42 = vadd.f32 %v1301_v38, %v314_v35 }
 0x18a   : > { %v1255_v44 = vpop.f32.mrf.mxu0  ;;  %v1303_v46 = vpop.f32.mrf.mxu1 }
 0x18b   : > { %843 = vst [vmem:[#allocation2 + $0xb8] sm:$0xff] %v811_v41  ;;  %859 = vst [vmem:[#allocation2 + $0x28] sm:$0xff] %v827_v42  ;;  %v1256_v47 = vadd.f32 %v1255_v44, %v1254_v39  ;;  %v1304_v48 = vadd.f32 %v1303_v46, %v1302_v40 }
 0x18c   : > { %v1257_v49 = vpop.f32.mrf.mxu0  ;;  %v1305_v50 = vpop.f32.mrf.mxu1 }
 0x18d   : > { %v812_v51 = vadd.f32 %v1256_v47, %v299_v43  ;;  %v828_v52 = vadd.f32 %v1304_v48, %v315_v45 }
 0x18e   : > { %v1258_v54 = vpop.f32.mrf.mxu0  ;;  %v1306_v56 = vpop.f32.mrf.mxu1 }
 0x18f   : > { %844 = vst [vmem:[#allocation2 + $0x60] sm:$0xff] %v812_v51  ;;  %860 = vst [vmem:[#allocation2 + $0xa0] sm:$0xff] %v828_v52  ;;  %v1259_v57 = vadd.f32 %v1258_v54, %v1257_v49  ;;  %v1307_v58 = vadd.f32 %v1306_v56, %v1305_v50 }
 0x190   : > { %v1260_v59 = vpop.f32.mrf.mxu0  ;;  %v1308_v60 = vpop.f32.mrf.mxu1 }
 0x191   : > { %v813_v61 = vadd.f32 %v1259_v57, %v300_v53  ;;  %v829_v62 = vadd.f32 %v1307_v58, %v316_v55 }
 0x192   : > { %v1261_v0 = vpop.f32.mrf.mxu0  ;;  %v1309_v2 = vpop.f32.mrf.mxu1 }
 0x193   : > { %845 = vst [vmem:[#allocation2 + $0xf0] sm:$0xff] %v813_v61  ;;  %861 = vst [vmem:[#allocation2 + $0xf8] sm:$0xff] %v829_v62  ;;  %v1262_v3 = vadd.f32 %v1261_v0, %v1260_v59  ;;  %v1310_v4 = vadd.f32 %v1309_v2, %v1308_v60 }
 0x194   : > { %v1263_v5 = vpop.f32.mrf.mxu0  ;;  %v1311_v6 = vpop.f32.mrf.mxu1 }
 0x195   : > { %v814_v7 = vadd.f32 %v1262_v3, %v301_v63  ;;  %v830_v8 = vadd.f32 %v1310_v4, %v317_v1 }
 0x196   : > { %v1264_v10 = vpop.f32.mrf.mxu0  ;;  %v1312_v12 = vpop.f32.mrf.mxu1 }
 0x197   : > { %846 = vst [vmem:[#allocation2 + $0x8] sm:$0xff] %v814_v7  ;;  %862 = vst [vmem:[#allocation2 + $0x20] sm:$0xff] %v830_v8  ;;  %v1265_v13 = vadd.f32 %v1264_v10, %v1263_v5  ;;  %v1313_v14 = vadd.f32 %v1312_v12, %v1311_v6  ;;  %867 = sbr.rel (%p1192_p1) target bundleno = 433 (0x1b1), region = 48 }
 0x199   : > { %v815_v15 = vadd.f32 %v1265_v13, %v302_v9  ;;  %v831_v16 = vadd.f32 %v1313_v14, %v318_v11 }
 0x19b   : > { %847 = vst [vmem:[#allocation2 + $0x78] sm:$0xff] %v815_v15  ;;  %863 = vst [vmem:[#allocation2 + $0x98] sm:$0xff] %v831_v16 }
 0x19c   : > { %v868_v17 = vld [vmem:[#allocation2 + $0xb0] sm:$0xff]  ;;  %v2031_v18 = vld [vmem:[%s2213_s3] ss:$0 sm:$0xff]  ;;  %v870_v22 = vld [vmem:[#allocation2 + $0xd8] sm:$0xff] }
 0x19d   : > { %v869_v19 = vld [vmem:[#allocation2] sm:$0xff]  ;;  %v907_v20 = vadd.f32 %v2031_v18, %v868_v17  ;;  %v871_v23 = vld [vmem:[#allocation2 + $0x18] sm:$0xff]  ;;  %v872_v24 = vld [vmem:[#allocation2 + $0x50] sm:$0xff]  ;;  %v909_v25 = vadd.f32 %v2031_v18, %v870_v22 }
 0x19e   : > { %v908_v21 = vadd.f32 %v2031_v18, %v869_v19  ;;  %v910_v26 = vadd.f32 %v2031_v18, %v871_v23  ;;  %v911_v27 = vadd.f32 %v2031_v18, %v872_v24  ;;  %v873_v28 = vld [vmem:[#allocation2 + $0x68] sm:$0xff]  ;;  %v874_v29 = vld [vmem:[#allocation2 + $0x30] sm:$0xff]  ;;  %v876_v35 = vld [vmem:[#allocation2 + $0x80] sm:$0xff] }
 0x19f   : > { %v875_v30 = vld [vmem:[#allocation2 + $0x48] sm:$0xff]  ;;  %v939_v31 = vmax.f32 %v907_v20, 0.0  ;;  %v912_v33 = vadd.f32 %v2031_v18, %v873_v28  ;;  %v913_v34 = vadd.f32 %v2031_v18, %v874_v29  ;;  %v941_v38 = vmax.f32 %v909_v25, 0.0  ;;  %v879_v42 = vld [vmem:[#allocation2 + $0xb8] sm:$0xff]  ;;  %v880_v43 = vld [vmem:[#allocation2 + $0x60] sm:$0xff] }
 0x1a0   : > { %v940_v32 = vmax.f32 %v908_v21, 0.0  ;;  %v877_v36 = vld [vmem:[#allocation2 + $0x88] sm:$0xff]  ;;  %v942_v39 = vmax.f32 %v910_v26, 0.0  ;;  %v943_v40 = vmax.f32 %v911_v27, 0.0  ;;  %v914_v41 = vadd.f32 %v2031_v18, %v875_v30  ;;  %v881_v44 = vld [vmem:[#allocation2 + $0xf0] sm:$0xff]  ;;  %v884_v55 = vld [vmem:[#allocation2 + $0x38] sm:$0xff] }
 0x1a1   : > { %v878_v37 = vld [vmem:[#allocation2 + $0xe8] sm:$0xff]  ;;  %971 = vst [vmem:[%s1976_s26] sm:$0xff] %v939_v31  ;;  %v944_v45 = vmax.f32 %v912_v33, 0.0  ;;  %v945_v46 = vmax.f32 %v913_v34, 0.0  ;;  %v915_v47 = vadd.f32 %v2031_v18, %v876_v35  ;;  %v916_v48 = vadd.f32 %v2031_v18, %v877_v36  ;;  %973 = vst [vmem:[%s1976_s26 + $0x10] sm:$0xff] %v941_v38  ;;  %v885_v56 = vld [vmem:[#allocation2 + $0x58] sm:$0xff] }
 0x1a2   : > { %972 = vst [vmem:[%s1976_s26 + $0x8] sm:$0xff] %v940_v32  ;;  %v882_v49 = vld [vmem:[#allocation2 + $0x8] sm:$0xff]  ;;  %v883_v50 = vld [vmem:[#allocation2 + $0x78] sm:$0xff]  ;;  %974 = vst [vmem:[%s1976_s26 + $0x18] sm:$0xff] %v942_v39  ;;  %v946_v51 = vmax.f32 %v914_v41, 0.0  ;;  %v917_v52 = vadd.f32 %v2031_v18, %v878_v37  ;;  %v918_v53 = vadd.f32 %v2031_v18, %v879_v42  ;;  %v919_v54 = vadd.f32 %v2031_v18, %v880_v43 }
 0x1a3   : > { %975 = vst [vmem:[%s1976_s26 + $0x20] sm:$0xff] %v943_v40  ;;  %976 = vst [vmem:[%s1976_s26 + $0x28] sm:$0xff] %v944_v45  ;;  %v947_v57 = vmax.f32 %v915_v47, 0.0  ;;  %v948_v58 = vmax.f32 %v916_v48, 0.0  ;;  %v920_v59 = vadd.f32 %v2031_v18, %v881_v44  ;;  %v921_v60 = vadd.f32 %v2031_v18, %v882_v49  ;;  %v886_v61 = vld [vmem:[#allocation2 + $0x40] sm:$0xff]  ;;  %v887_v62 = vld [vmem:[#allocation2 + $0xc8] sm:$0xff] }
 0x1a4   : > { %977 = vst [vmem:[%s1976_s26 + $0x30] sm:$0xff] %v945_v46  ;;  %v888_v63 = vld [vmem:[#allocation2 + $0xe0] sm:$0xff]  ;;  %978 = vst [vmem:[%s1976_s26 + $0x38] sm:$0xff] %v946_v51  ;;  %v949_v0 = vmax.f32 %v917_v52, 0.0  ;;  %v950_v1 = vmax.f32 %v918_v53, 0.0  ;;  %v951_v2 = vmax.f32 %v919_v54, 0.0  ;;  %v922_v3 = vadd.f32 %v2031_v18, %v883_v50 }
 0x1a5   : > { %v889_v4 = vld [vmem:[#allocation2 + $0x90] sm:$0xff]  ;;  %979 = vst [vmem:[%s1976_s26 + $0x40] sm:$0xff] %v947_v57  ;;  %980 = vst [vmem:[%s1976_s26 + $0x48] sm:$0xff] %v948_v58  ;;  %v952_v6 = vmax.f32 %v920_v59, 0.0  ;;  %v953_v7 = vmax.f32 %v921_v60, 0.0  ;;  %v923_v8 = vadd.f32 %v2031_v18, %v884_v55  ;;  %v924_v9 = vadd.f32 %v2031_v18, %v885_v56  ;;  %v891_v10 = vld [vmem:[#allocation2 + $0xc0] sm:$0xff] }
 0x1a6   : > { %v890_v5 = vld [vmem:[#allocation2 + $0x70] sm:$0xff]  ;;  %981 = vst [vmem:[%s1976_s26 + $0x50] sm:$0xff] %v949_v0  ;;  %982 = vst [vmem:[%s1976_s26 + $0x58] sm:$0xff] %v950_v1  ;;  %v954_v11 = vmax.f32 %v922_v3, 0.0  ;;  %v925_v12 = vadd.f32 %v2031_v18, %v886_v61  ;;  %v926_v13 = vadd.f32 %v2031_v18, %v887_v62  ;;  %v927_v14 = vadd.f32 %v2031_v18, %v888_v63  ;;  %v892_v15 = vld [vmem:[#allocation2 + $0xa8] sm:$0xff] }
 0x1a7   : > { %983 = vst [vmem:[%s1976_s26 + $0x60] sm:$0xff] %v951_v2  ;;  %v893_v16 = vld [vmem:[#allocation2 + $0xd0] sm:$0xff]  ;;  %984 = vst [vmem:[%s1976_s26 + $0x68] sm:$0xff] %v952_v6  ;;  %v955_v17 = vmax.f32 %v923_v8, 0.0  ;;  %v956_v19 = vmax.f32 %v924_v9, 0.0  ;;  %v928_v20 = vadd.f32 %v2031_v18, %v889_v4  ;;  %v929_v21 = vadd.f32 %v2031_v18, %v890_v5  ;;  %v895_v23 = vld [vmem:[#allocation2 + $0x28] sm:$0xff] }
 0x1a8   : > { %985 = vst [vmem:[%s1976_s26 + $0x70] sm:$0xff] %v953_v7  ;;  %v894_v22 = vld [vmem:[#allocation2 + $0x10] sm:$0xff]  ;;  %v896_v24 = vld [vmem:[#allocation2 + $0xa0] sm:$0xff]  ;;  %986 = vst [vmem:[%s1976_s26 + $0x78] sm:$0xff] %v954_v11  ;;  %v957_v25 = vmax.f32 %v925_v12, 0.0  ;;  %v958_v26 = vmax.f32 %v926_v13, 0.0  ;;  %v930_v28 = vadd.f32 %v2031_v18, %v891_v10  ;;  %v931_v33 = vadd.f32 %v2031_v18, %v892_v15 }
 0x1a9   : > { %v959_v27 = vmax.f32 %v927_v14, 0.0  ;;  %v897_v29 = vld [vmem:[#allocation2 + $0xf8] sm:$0xff]  ;;  %v898_v30 = vld [vmem:[#allocation2 + $0x20] sm:$0xff]  ;;  %987 = vst [vmem:[%s1976_s26 + $0x80] sm:$0xff] %v955_v17  ;;  %988 = vst [vmem:[%s1976_s26 + $0x88] sm:$0xff] %v956_v19  ;;  %v960_v31 = vmax.f32 %v928_v20, 0.0  ;;  %v932_v34 = vadd.f32 %v2031_v18, %v893_v16  ;;  %v933_v37 = vadd.f32 %v2031_v18, %v894_v22 }
 0x1aa   : > { %v961_v32 = vmax.f32 %v929_v21, 0.0  ;;  %v899_v35 = vld [vmem:[#allocation2 + $0x98] sm:$0xff]  ;;  %989 = vst [vmem:[%s1976_s26 + $0x90] sm:$0xff] %v957_v25  ;;  %990 = vst [vmem:[%s1976_s26 + $0x98] sm:$0xff] %v958_v26  ;;  %v962_v36 = vmax.f32 %v930_v28, 0.0  ;;  %v934_v38 = vadd.f32 %v2031_v18, %v895_v23  ;;  %v935_v39 = vadd.f32 %v2031_v18, %v896_v24 }
 0x1ab   : > { %991 = vst [vmem:[%s1976_s26 + $0xa0] sm:$0xff] %v959_v27  ;;  %992 = vst [vmem:[%s1976_s26 + $0xa8] sm:$0xff] %v960_v31  ;;  %v963_v40 = vmax.f32 %v931_v33, 0.0  ;;  %v964_v41 = vmax.f32 %v932_v34, 0.0  ;;  %v936_v42 = vadd.f32 %v2031_v18, %v897_v29  ;;  %v937_v43 = vadd.f32 %v2031_v18, %v898_v30 }
 0x1ac   : > { %993 = vst [vmem:[%s1976_s26 + $0xb0] sm:$0xff] %v961_v32  ;;  %994 = vst [vmem:[%s1976_s26 + $0xb8] sm:$0xff] %v962_v36  ;;  %v965_v44 = vmax.f32 %v933_v37, 0.0  ;;  %v966_v45 = vmax.f32 %v934_v38, 0.0  ;;  %v967_v46 = vmax.f32 %v935_v39, 0.0  ;;  %v938_v47 = vadd.f32 %v2031_v18, %v899_v35 }
 0x1ad   : > { %995 = vst [vmem:[%s1976_s26 + $0xc0] sm:$0xff] %v963_v40  ;;  %996 = vst [vmem:[%s1976_s26 + $0xc8] sm:$0xff] %v964_v41  ;;  %v968_v48 = vmax.f32 %v936_v42, 0.0  ;;  %v969_v49 = vmax.f32 %v937_v43, 0.0 }
 0x1ae   : > { %997 = vst [vmem:[%s1976_s26 + $0xd0] sm:$0xff] %v965_v44  ;;  %998 = vst [vmem:[%s1976_s26 + $0xd8] sm:$0xff] %v966_v45  ;;  %v970_v50 = vmax.f32 %v938_v47, 0.0 }
 0x1af   : > { %999 = vst [vmem:[%s1976_s26 + $0xe0] sm:$0xff] %v967_v46  ;;  %1000 = vst [vmem:[%s1976_s26 + $0xe8] sm:$0xff] %v968_v48 }
 0x1b0   : > { %1001 = vst [vmem:[%s1976_s26 + $0xf0] sm:$0xff] %v969_v49  ;;  %1002 = vst [vmem:[%s1976_s26 + $0xf8] sm:$0xff] %v970_v50 }
 0x1b1 PF: > { %s2214_s15 = sld [smem:[#allocation13_spill]]  ;;  %s1017_s21 = sshll.u32 %s1976_s26, 4  ;;  %s2104_s21 = int_to_ptr.vmem [resolvable:$true] %s1017_s21 }
 0x1b2   : > { %s2215_s0 = sld [smem:[#allocation19_spill]]  ;;  %s2108_s8 = scalar_lea.sflag [#allocation5], %s243_s11 }
 0x1b3   : > { %s1589_s7 = scalar_lea.vmem %s2104_s21, 4096  ;;  %s1747_s27 = smov [#allocation8]  }
 0x1b4   : > { %p1590_p3 = scmp.ne.s32.totalorder %s2104_s21, %s1589_s7  ;;  %s1593_s29 = sshll.u32 %s1747_s27, 4  ;;  %s1594_s29 = int_to_ptr.vmem [resolvable:$false] %s1593_s29 }
 0x1b5   : > { %s1595_s2 = scalar_lea.vmem %s1594_s29, 8192  ;;  %p1596_p12 = scmp.lt.s32.totalorder %s2104_s21, %s1594_s29 }
 0x1b6   : > { %p1591_p13 = pnand %p1590_p3, %p1932_p6  ;;  %p1597_p0 = scmp.lt.s32.totalorder %s1595_s2, %s1589_s7 }
 0x1b7   : > { %s1201_s30 = sshll.u32 %s2214_s15, 12 }
 0x1b8   : > { %s2101_s6 = scalar_lea.hbm %s2215_s0, %s1201_s30  ;;  %p1592_p2 = pneg %p1591_p13 }
 0x1b9   : > { %p1598_p9 = por %p1597_p0, %p1596_p12 }
 0x1bb   : > { %p1599_p4 = pnand %p1598_p9, %p1592_p2 }
 0x1bd   : > { %1602 = shalt.err (!%p1599_p4)
}
 0x1be   : > { %s1603_s11 = scalar_lea.hbm %s2101_s6, 4096  ;;  %s1607_s3 = scalar_lea.hbm %s2215_s0, 8192 }
 0x1bf   : > { %p1604_p7 = scmp.ne.s32.totalorder %s2101_s6, %s1603_s11  ;;  %p1608_p10 = scmp.lt.s32.totalorder %s2101_s6, %s2215_s0 }
 0x1c0   : > { %p1609_p11 = scmp.lt.s32.totalorder %s1607_s3, %s1603_s11 }
 0x1c1   : > { %p1605_p5 = pnand %p1604_p7, %p1932_p6 }
 0x1c2   : > { %p1610_p1 = por %p1609_p11, %p1608_p10 }
 0x1c3   : > { %p1606_p8 = pneg %p1605_p5 }
 0x1c5   : > { %p1611_p3 = pnand %p1610_p1, %p1606_p8 }
 0x1c7   : > { %1614 = shalt.err (!%p1611_p3)
}
 0x1c8   : > { %s1748_s24 = smov 128   ;;  %s1749_s5 = smov 8  }
 0x1c9   : > { %1334 = dma.vmem_to_hbm [thread:$0]  (%p1932_p6), %s2104_s21, 4096, %s2101_s6, %s2108_s8, %s1748_s24, %s1748_s24, %s1749_s5  }
 0x1ca PF: > { %p1348_p13 = scmp.ge.s32.totalorder %s1737_s25, 2  ;;  %s1032_s7 = sand.u32 1, %s1685_s12  }
 0x1cb   : > { %p2216_p2 = scmp.ne.s32.totalorder %s2208_s28, 0  ;;  %s1033_s27 = scalar_lea.sflag [#allocation5], %s1032_s7 }
 0x1cd   : > { %p1344_p12 = pnand %p1348_p13, %p2216_p2 }
 0x1cf   : > { %p1345_p0 = pneg %p1344_p12 }
 0x1d1   : > { %1680 = dma.done.wait (%p1345_p0), %s1033_s27, 4096  }
 0x1d2   : > { %1682 = vsyncadd (%p1345_p0), %s1033_s27, 4294963200  ;;  %s22_s25 = sadd.s32 1, %s1737_s25   ;;  %s2218_s28 = sld [smem:[#allocation14_spill]] }
 0x1d3   : > { %p2136_p9 = scmp.ge.s32.totalorder %s22_s25, 6   ;;  %s2219_s6 = sld [smem:[#allocation15_spill]] }
 0x1d4   : > { %s2220_s24 = sld [smem:[#allocation16_spill]]  ;;  %s2221_s12 = smov %s1689_s13 }
 0x1d5   : > { %s2222_s13 = smov %s1693_s14  ;;  %s2223_s14 = smov %s1870_s9 }
 0x1d6   : > { %s2224_s15 = smov %s1701_s16  ;;  %s2225_s16 = smov %s1705_s17 }
 0x1d7   : > { %s2226_s17 = smov %s1916_s22  ;;  %s2227_s18 = smov %s1713_s19 }
 0x1d8   : > { %s2228_s19 = smov %s1717_s20  ;;  %s2229_s20 = smov %s1873_s10 }
 0x1d9   : > { %s2230_s21 = smov %s1729_s23  ;;  %s2231_s22 = smov %s2218_s28 }
 0x1da   : > { %s2232_s23 = smov %s2219_s6  ;;  %21 = sbr.rel (!%p2136_p9) target bundleno = 16 (0x10), region = 98 }
 0x1df   :  { %1038 = vsyncpa [#allocation4], 1 }
 0x1e0   :  { %1040 = vsyncpa [#allocation4 + $0x1], 1 }
 0x1e1   :  { %1041 = vsyncpa [#allocation7], 1 }
 0x1e2   :  { %1043 = vsyncpa [#allocation7 + $0x1], 1 }
 0x1e3   :  { %1044 = vsyncpa [#allocation5], 1 }
 0x1e4   :  { %1046 = vsyncpa [#allocation5 + $0x1], 1 }

</bundles_post_ra>
